<compile_context>
chip_gen: v6e
topology: v6e:2x2x1
jax: 0.10.0
libtpu: 0.0.40
codegen_flags: <defaults>
</compile_context>

<pallas_src>
import math
import functools

import jax
import jax.numpy as jnp
from jax.experimental import pallas as pl
from jax.experimental.pallas import tpu as pltpu


# ---------------------------------------------------------------------------
# Kernel
# ---------------------------------------------------------------------------

def _score_head_kernel(x_ref, w1_ref, b1_ref, w2_ref, bias_ref, out_ref, *,
                       eps, approximate_gelu):
    # x_ref:    (tm, d_model)         activation tile (f32 or bf16)
    # w1_ref:   (d_model, d_model)    dense weight, pre-transposed, bf16
    # b1_ref:   (1, d_model)          dense bias, f32
    # w2_ref:   (d_model, n_cls_pad)  decoder weight, pre-transposed, bf16,
    #                                 LN scale folded in, lane-padded
    # bias_ref: (1, n_cls_pad)        bias + ln_b @ W2^T, f32, lane-padded
    # out_ref:  (tm, n_cls_pad)       logits tile (f32)
    x = x_ref[...].astype(jnp.bfloat16)

    # dense: bf16 MXU operands, f32 accumulation
    h = jnp.dot(x, w1_ref[...], preferred_element_type=jnp.float32)
    h = h + b1_ref[...]

    if approximate_gelu:
        # tanh-form GELU -> transcendental goes to the EUP slot (frees VALU);
        # ~1e-3 deviation from the exact erf form.
        h = jax.nn.gelu(h, approximate=True)
    else:
        # exact erf-based gelu (matches the ESM reference / torch.erf)
        h = h * 0.5 * (1.0 + jax.lax.erf(h * (1.0 / math.sqrt(2.0))))

    # single-pass LayerNorm statistics: var = E[h^2] - mean^2
    inv_d = 1.0 / h.shape[-1]
    mean = jnp.sum(h, axis=-1, keepdims=True) * inv_d
    meansq = jnp.sum(h * h, axis=-1, keepdims=True) * inv_d
    var = meansq - mean * mean
    h_norm = (h - mean) * jax.lax.rsqrt(var + eps)

    # decoder (LN affine already folded into w2/bias); bf16 MXU operands
    logits = jnp.dot(h_norm.astype(jnp.bfloat16), w2_ref[...],
                     preferred_element_type=jnp.float32)
    out_ref[...] = (logits + bias_ref[...]).astype(out_ref.dtype)


# ---------------------------------------------------------------------------
# One-time capability / hardware queries (cached at module level)
# ---------------------------------------------------------------------------

@functools.lru_cache(maxsize=None)
def _vmem_cap_bytes():
    """Per-generation VMEM budget with ~15% headroom for compiler scratch."""
    cap = 64 << 20  # conservative default (v7x per-TC physical VMEM)
    try:
        info = pltpu.get_tpu_info()
        cap = int(getattr(info, "vmem_capacity_bytes", cap))
    except Exception:
        pass
    return int(cap * 0.85)


@functools.lru_cache(maxsize=None)
def _buffered_one_supported():
    """One-time compile-only probe: does this Pallas build accept
    pipeline_mode=pl.Buffered(1) for constant (revisited) operands?"""
    if not hasattr(pl, "Buffered"):
        return False
    try:
        const_spec = pl.BlockSpec((8, 128), lambda i: (0, 0),
                                  pipeline_mode=pl.Buffered(1))
    except Exception:
        return False

    def _probe(x_ref, c_ref, o_ref):
        o_ref[...] = x_ref[...] + c_ref[...]

    try:
        fn = pl.pallas_call(
            _probe,
            out_shape=jax.ShapeDtypeStruct((8, 128), jnp.float32),
            grid=(1,),
            in_specs=[pl.BlockSpec((8, 128), lambda i: (0, 0)), const_spec],
            out_specs=pl.BlockSpec((8, 128), lambda i: (0, 0)),
        )
        x = jnp.zeros((8, 128), jnp.float32)
        jax.jit(fn).lower(x, x).compile()
        return True
    except Exception:
        return False


def _vmem_need_bytes(tile_m, d_model, n_cls_pad, x_itemsize, weight_bufs):
    bf16, f32 = 2, 4
    # resident weight/bias operands (x1 if Buffered(1), x2 if double-buffered)
    const = weight_bufs * (d_model * d_model * bf16
                           + d_model * n_cls_pad * bf16
                           + d_model * f32 + n_cls_pad * f32)
    # streamed x tile + logits tile, double-buffered
    stream = 2 * tile_m * d_model * x_itemsize + 2 * tile_m * n_cls_pad * f32
    # f32 intermediates (h, h_norm) + compiler temporaries headroom
    scratch = 3 * tile_m * d_model * f32
    return const + stream + scratch


# ---------------------------------------------------------------------------
# Parameter preparation (do ONCE at load time, cache in the param pytree)
# ---------------------------------------------------------------------------

def prepare_score_head_params(params):
    """Transpose, cast to bf16, fold the LN affine into the decoder, and
    lane-pad num_classes to a multiple of 128. Returns (prepared, num_classes).
    """
    d_model = params["dense_w"].shape[0]
    num_classes = params["decoder_w"].shape[0]
    n_cls_pad = 128 * pl.cdiv(num_classes, 128)
    pad_n = n_cls_pad - num_classes

    w1_t = jnp.asarray(params["dense_w"], jnp.float32).T.astype(jnp.bfloat16)
    b1 = jnp.asarray(params["dense_b"], jnp.float32).reshape(1, d_model)

    ln_w = jnp.asarray(params["ln_w"], jnp.float32)
    ln_b = jnp.asarray(params["ln_b"], jnp.float32)
    w2_t = jnp.asarray(params["decoder_w"], jnp.float32).T          # (d, C)

    # fold LN affine:  (h_n * ln_w + ln_b) @ W2^T + bias
    #                = h_n @ (ln_w[:,None] * W2^T) + (ln_b @ W2^T + bias)
    w2_t_folded = (ln_w[:, None] * w2_t).astype(jnp.bfloat16)        # (d, C)
    bias_folded = (jnp.asarray(params["bias"], jnp.float32)
                   + ln_b @ w2_t).reshape(1, num_classes)

    if pad_n:
        w2_t_folded = jnp.pad(w2_t_folded, ((0, 0), (0, pad_n)))
        bias_folded = jnp.pad(bias_folded, ((0, 0), (0, pad_n)))

    prepared = {"w1_t": w1_t, "b1": b1,
                "w2_t": w2_t_folded, "bias": bias_folded}
    return prepared, num_classes


# ---------------------------------------------------------------------------
# Forward
# ---------------------------------------------------------------------------

def score_head_forward(features, prepared, num_classes, *, eps=1e-5,
                       tile_m=256, approximate_gelu=False):
    """features: (..., d_model) -> logits: (..., num_classes), f32.

    `prepared` comes from prepare_score_head_params (weights pre-transposed /
    cast / padded once). bf16 features are streamed as-is (halved input DMA).
    """
    d_model = features.shape[-1]
    lead_shape = features.shape[:-1]
    n_cls_pad = prepared["w2_t"].shape[1]
    assert prepared["w1_t"].shape == (d_model, d_model)

    x2d = features.reshape(-1, d_model)
    if x2d.dtype not in (jnp.bfloat16, jnp.float32):
        x2d = x2d.astype(jnp.float32)
    n_rows = x2d.shape[0]

    # Only pad rows to a sublane multiple (8) if strictly needed; the ragged
    # last tile_m block is handled by cdiv + Pallas write clipping (safe: all
    # ops are strictly row-independent).
    pad8 = (-n_rows) % 8
    if pad8:
        x2d = jnp.pad(x2d, ((0, pad8), (0, 0)))
    n8 = n_rows + pad8

    buffered_ok = _buffered_one_supported()
    weight_bufs = 1 if buffered_ok else 2
    x_itemsize = jnp.dtype(x2d.dtype).itemsize
    cap = _vmem_cap_bytes()

    # Clamp tile_m to the row count and shrink it until the VMEM budget fits.
    tile_m = max(8, (min(int(tile_m), n8) // 8) * 8)
    need = _vmem_need_bytes(tile_m, d_model, n_cls_pad, x_itemsize, weight_bufs)
    while need > cap and tile_m > 8:
        tile_m = max(8, ((tile_m // 2) // 8) * 8)
        need = _vmem_need_bytes(tile_m, d_model, n_cls_pad, x_itemsize,
                                weight_bufs)
    if need > cap:
        # TODO(synk): K-tile W1/W2 (stream (d, tk) blocks over an 'arbitrary'
        # grid axis with a VMEM accumulator) for d_model too large for
        # single-buffered weight residency on this generation.
        raise ValueError(
            f"ScoreHead weights (+minimum tile) need ~{need >> 20} MiB VMEM "
            f"but only ~{cap >> 20} MiB is budgeted "
            f"(d_model={d_model}, n_cls_pad={n_cls_pad}, "
            f"single_buffered_weights={buffered_ok}).")

    grid = (pl.cdiv(n8, tile_m),)

    def const_spec(shape):
        if buffered_ok:
            # constant blocks never change -> no need to double-buffer them
            return pl.BlockSpec(shape, lambda i: (0, 0),
                                pipeline_mode=pl.Buffered(1))
        return pl.BlockSpec(shape, lambda i: (0, 0))

    grid_spec = pltpu.PrefetchScalarGridSpec(
        num_scalar_prefetch=0,
        grid=grid,
        in_specs=[
            pl.BlockSpec((tile_m, d_model), lambda i: (i, 0)),   # x tile
            const_spec((d_model, d_model)),                      # W1^T (bf16)
            const_spec((1, d_model)),                            # b1
            const_spec((d_model, n_cls_pad)),                    # W2' (bf16)
            const_spec((1, n_cls_pad)),                          # bias'
        ],
        out_specs=pl.BlockSpec((tile_m, n_cls_pad), lambda i: (i, 0)),
    )

    kernel = functools.partial(_score_head_kernel, eps=float(eps),
                               approximate_gelu=bool(approximate_gelu))
    compiler_params = pltpu.CompilerParams(
        dimension_semantics=("parallel",),
        vmem_limit_bytes=int(min(cap, max(16 << 20, int(1.25 * need)))),
    )

    out = pl.pallas_call(
        kernel,
        out_shape=jax.ShapeDtypeStruct((n8, n_cls_pad), jnp.float32),
        grid_spec=grid_spec,
        compiler_params=compiler_params,
    )(x2d, prepared["w1_t"], prepared["b1"], prepared["w2_t"],
      prepared["bias"])

    out = out[:n_rows, :num_classes]
    return out.reshape(*lead_shape, num_classes)


# ---------------------------------------------------------------------------
# Init + pure-JAX reference
# ---------------------------------------------------------------------------

def init_score_head_params(key, d_model, num_classes):
    """Matches the module's init_weights: Linear weights ~ N(0, 0.02),
    Linear biases = 0, LayerNorm w=1 b=0, extra bias = 0."""
    k1, k2 = jax.random.split(key)
    return {
        "dense_w": 0.02 * jax.random.normal(k1, (d_model, d_model), jnp.float32),
        "dense_b": jnp.zeros((d_model,), jnp.float32),
        "ln_w": jnp.ones((d_model,), jnp.float32),
        "ln_b": jnp.zeros((d_model,), jnp.float32),
        "decoder_w": 0.02 * jax.random.normal(k2, (num_classes, d_model), jnp.float32),
        "bias": jnp.zeros((num_classes,), jnp.float32),
    }


def _reference_forward(features, params, eps=1e-5):
    """Plain-JAX f32 reference of the PyTorch forward pass."""
    x = features @ params["dense_w"].T + params["dense_b"]
    x = x * 0.5 * (1.0 + jax.lax.erf(x / math.sqrt(2.0)))
    mean = jnp.mean(x, axis=-1, keepdims=True)
    var = jnp.mean((x - mean) ** 2, axis=-1, keepdims=True)
    x = (x - mean) * jax.lax.rsqrt(var + eps) * params["ln_w"] + params["ln_b"]
    return x @ params["decoder_w"].T + params["bias"]


if __name__ == "__main__":
    # small config: batch=2, seq=8, d_model=32, num_classes=16
    batch, seq, d_model, num_classes = 2, 8, 32, 16
    eps = 1e-5

    key = jax.random.PRNGKey(0)
    k_x, k_p = jax.random.split(key)

    features = jax.random.normal(k_x, (batch, seq, d_model), jnp.float32)
    params = init_score_head_params(k_p, d_model, num_classes)

    # one-time weight prep (cache this alongside the params in real use)
    prepared, n_cls = prepare_score_head_params(params)

    out = score_head_forward(features, prepared, n_cls, eps=eps)
    out = jax.block_until_ready(out)

    ref = _reference_forward(features, params, eps=eps)
    assert out.shape == (batch, seq, num_classes)
    # bf16 MXU operands (f32 accumulation) => slightly looser tolerance than
    # a pure-f32 path; observed error is ~1e-3 at these scales.
    assert jnp.allclose(out, ref, atol=2e-2, rtol=2e-2)

    # exercise the bf16 activation-streaming path (halved input DMA on v6e/v7x)
    out_bf16 = score_head_forward(features.astype(jnp.bfloat16), prepared,
                                  n_cls, eps=eps)
    out_bf16 = jax.block_until_ready(out_bf16)
    assert out_bf16.shape == (batch, seq, num_classes)
    assert bool(jnp.all(jnp.isfinite(out_bf16)))
    assert jnp.allclose(out_bf16, ref, atol=5e-2, rtol=5e-2)

    print("KERNEL_OK")
</pallas_src>

<mosaic_0001>
module attributes {stable_mosaic.version = 11 : i64} {
  func.func @_score_head_kernel(%arg0: i32, %arg1: memref<16x32xf32, #tpu.memory_space<vmem>>, %arg2: memref<32x32xbf16, #tpu.memory_space<vmem>>, %arg3: memref<1x32xf32, #tpu.memory_space<vmem>>, %arg4: memref<32x128xbf16, #tpu.memory_space<vmem>>, %arg5: memref<1x128xf32, #tpu.memory_space<vmem>>, %arg6: memref<16x128xf32, #tpu.memory_space<vmem>>) attributes {dimension_semantics = [#tpu.dimension_semantics<parallel>], iteration_bounds = array<i64: 1>, scalar_prefetch = 0 : i64, scratch_operands = 0 : i64, tpu.core_type = #tpu.core_type<tc>, window_params = [{transform_indices = @transform_0, window_bounds = array<i64: 16, 32>}, {pipeline_mode = #tpu.pipeline_mode<synchronous>, transform_indices = @transform_1, window_bounds = array<i64: 32, 32>}, {pipeline_mode = #tpu.pipeline_mode<synchronous>, transform_indices = @transform_2, window_bounds = array<i64: 1, 32>}, {pipeline_mode = #tpu.pipeline_mode<synchronous>, transform_indices = @transform_3, window_bounds = array<i64: 32, 128>}, {pipeline_mode = #tpu.pipeline_mode<synchronous>, transform_indices = @transform_4, window_bounds = array<i64: 1, 128>}, {transform_indices = @transform_5, window_bounds = array<i64: 16, 128>}]} {
    %c0 = arith.constant 0 : index
    %c0_0 = arith.constant 0 : index
    %0 = vector.load %arg1[%c0, %c0_0] : memref<16x32xf32, #tpu.memory_space<vmem>>, vector<16x32xf32>
    %1 = arith.truncf %0 : vector<16x32xf32> to vector<16x32xbf16>
    %c0_1 = arith.constant 0 : index
    %c0_2 = arith.constant 0 : index
    %2 = vector.load %arg2[%c0_1, %c0_2] : memref<32x32xbf16, #tpu.memory_space<vmem>>, vector<32x32xbf16>
    %cst = arith.constant dense<0.000000e+00> : vector<16x32xf32>
    %3 = tpu.matmul %1, %2, %cst {dimension_numbers = #tpu.dot_dimension_numbers<[1], [0], [0], [1], [0, 0, 1, 1], [], []>} : vector<16x32xbf16>, vector<32x32xbf16>, vector<16x32xf32> -> vector<16x32xf32>
    %c0_3 = arith.constant 0 : index
    %c0_4 = arith.constant 0 : index
    %4 = vector.load %arg3[%c0_3, %c0_4] : memref<1x32xf32, #tpu.memory_space<vmem>>, vector<1x32xf32>
    %5 = vector.broadcast %4 : vector<1x32xf32> to vector<16x32xf32>
    %6 = arith.addf %3, %5 : vector<16x32xf32>
    %cst_5 = arith.constant 5.000000e-01 : f32
    %7 = vector.broadcast %cst_5 : f32 to vector<16x32xf32>
    %8 = arith.mulf %6, %7 : vector<16x32xf32>
    %cst_6 = arith.constant 0.707106769 : f32
    %9 = vector.broadcast %cst_6 : f32 to vector<16x32xf32>
    %10 = arith.mulf %6, %9 : vector<16x32xf32>
    %11 = math.erf %10 : vector<16x32xf32>
    %cst_7 = arith.constant 1.000000e+00 : f32
    %12 = vector.broadcast %cst_7 : f32 to vector<16x32xf32>
    %13 = arith.addf %12, %11 : vector<16x32xf32>
    %14 = arith.mulf %8, %13 : vector<16x32xf32>
    %cst_8 = arith.constant dense<0.000000e+00> : vector<16xf32>
    %15 = vector.multi_reduction <add>, %14, %cst_8 [1] : vector<16x32xf32> to vector<16xf32>
    %16 = vector.shape_cast %15 : vector<16xf32> to vector<16x1xf32>
    %cst_9 = arith.constant 3.125000e-02 : f32
    %17 = vector.broadcast %cst_9 : f32 to vector<16x1xf32>
    %18 = arith.mulf %16, %17 : vector<16x1xf32>
    %19 = arith.mulf %14, %14 : vector<16x32xf32>
    %cst_10 = arith.constant dense<0.000000e+00> : vector<16xf32>
    %20 = vector.multi_reduction <add>, %19, %cst_10 [1] : vector<16x32xf32> to vector<16xf32>
    %21 = vector.shape_cast %20 : vector<16xf32> to vector<16x1xf32>
    %cst_11 = arith.constant 3.125000e-02 : f32
    %22 = vector.broadcast %cst_11 : f32 to vector<16x1xf32>
    %23 = arith.mulf %21, %22 : vector<16x1xf32>
    %24 = arith.mulf %18, %18 : vector<16x1xf32>
    %25 = arith.subf %23, %24 : vector<16x1xf32>
    %26 = vector.broadcast %18 : vector<16x1xf32> to vector<16x32xf32>
    %27 = arith.subf %14, %26 : vector<16x32xf32>
    %cst_12 = arith.constant 9.99999974E-6 : f32
    %28 = vector.broadcast %cst_12 : f32 to vector<16x1xf32>
    %29 = arith.addf %25, %28 : vector<16x1xf32>
    %30 = math.rsqrt %29 : vector<16x1xf32>
    %31 = vector.broadcast %30 : vector<16x1xf32> to vector<16x32xf32>
    %32 = arith.mulf %27, %31 : vector<16x32xf32>
    %33 = arith.truncf %32 : vector<16x32xf32> to vector<16x32xbf16>
    %c0_13 = arith.constant 0 : index
    %c0_14 = arith.constant 0 : index
    %34 = vector.load %arg4[%c0_13, %c0_14] : memref<32x128xbf16, #tpu.memory_space<vmem>>, vector<32x128xbf16>
    %cst_15 = arith.constant dense<0.000000e+00> : vector<16x128xf32>
    %35 = tpu.matmul %33, %34, %cst_15 {dimension_numbers = #tpu.dot_dimension_numbers<[1], [0], [0], [1], [0, 0, 1, 1], [], []>} : vector<16x32xbf16>, vector<32x128xbf16>, vector<16x128xf32> -> vector<16x128xf32>
    %c0_16 = arith.constant 0 : index
    %c0_17 = arith.constant 0 : index
    %36 = vector.load %arg5[%c0_16, %c0_17] : memref<1x128xf32, #tpu.memory_space<vmem>>, vector<1x128xf32>
    %37 = vector.broadcast %36 : vector<1x128xf32> to vector<16x128xf32>
    %38 = arith.addf %35, %37 : vector<16x128xf32>
    %c0_18 = arith.constant 0 : index
    %c0_19 = arith.constant 0 : index
    %39 = vector.load %arg6[%c0_18, %c0_19] : memref<16x128xf32, #tpu.memory_space<vmem>>, vector<16x128xf32>
    tpu.vector_store %arg6[%c0_18, %c0_19], %38 {strides = array<i32>} : memref<16x128xf32, #tpu.memory_space<vmem>>, vector<16x128xf32>,
    return
  }
  func.func @transform_0(%arg0: i32) -> (i32, i32) {
    %c0_i32 = arith.constant 0 : i32
    %c0_i32_0 = arith.constant 0 : i32
    return %arg0, %c0_i32 : i32, i32
  }
  func.func @transform_1(%arg0: i32) -> (i32, i32) {
    %c0_i32 = arith.constant 0 : i32
    %c0_i32_0 = arith.constant 0 : i32
    %c0_i32_1 = arith.constant 0 : i32
    return %c0_i32, %c0_i32_0 : i32, i32
  }
  func.func @transform_2(%arg0: i32) -> (i32, i32) {
    %c0_i32 = arith.constant 0 : i32
    %c0_i32_0 = arith.constant 0 : i32
    %c0_i32_1 = arith.constant 0 : i32
    return %c0_i32, %c0_i32_0 : i32, i32
  }
  func.func @transform_3(%arg0: i32) -> (i32, i32) {
    %c0_i32 = arith.constant 0 : i32
    %c0_i32_0 = arith.constant 0 : i32
    %c0_i32_1 = arith.constant 0 : i32
    return %c0_i32, %c0_i32_0 : i32, i32
  }
  func.func @transform_4(%arg0: i32) -> (i32, i32) {
    %c0_i32 = arith.constant 0 : i32
    %c0_i32_0 = arith.constant 0 : i32
    %c0_i32_1 = arith.constant 0 : i32
    return %c0_i32, %c0_i32_0 : i32, i32
  }
  func.func @transform_5(%arg0: i32) -> (i32, i32) {
    %c0_i32 = arith.constant 0 : i32
    %c0_i32_0 = arith.constant 0 : i32
    return %arg0, %c0_i32 : i32, i32
  }
}

</mosaic_0001>

<bundles_post_ra>
// kernel: tpu_custom_call.1
= control target key start
LH: loop header
LB: loop body
LE: loop exit
PB: predicated region body
PF: predicated region fallthrough
CT: control target
= control target key end

     0   :  { %10 = vsyncpa [#allocation3], 0  ;;  %s470_s0 = inlined_call_operand.hbm [shape: f32[16,32], index: 0, kind: input, shape index: {}]   ;;  %s471_s1 = inlined_call_operand.hbm [shape: bf16[32,32], index: 1, kind: input, shape index: {}]   ;;  %s472_s2 = inlined_call_operand.vmem [shape: f32[1,32], index: 2, kind: input, shape index: {}]   ;;  %s473_s3 = inlined_call_operand.hbm [shape: bf16[32,128], index: 3, kind: input, shape index: {}]   ;;  %s474_s4 = inlined_call_operand.vmem [shape: f32[1,128], index: 4, kind: input, shape index: {}]   ;;  %s475_s5 = inlined_call_operand.hbm [shape: f32[16,128], index: 5, kind: output, shape index: {}]  }
   0x1   :  { %11 = vsyncpa [#allocation6], 0 }
   0x2   :  { %12 = vsyncpa [#allocation4], 0  ;;  %s400_s18 = smov [#allocation5]  }
   0x3   :  { %s30_s19 = sshll.u32 %s400_s18, 4  ;;  %s31_s19 = int_to_ptr.vmem [resolvable:$true] %s30_s19 }
   0x4   :  { %s322_s20 = scalar_lea.vmem %s31_s19, 256  ;;  %p327_p1 = scmp.lt.s32.totalorder %s31_s19, %s31_s19 }
   0x5   :  { %p323_p0 = scmp.ne.s32.totalorder %s31_s19, %s322_s20  ;;  %p328_p2 = scmp.lt.s32.totalorder %s322_s20, %s322_s20 }
   0x7   :  { %p329_p3 = por %p328_p2, %p327_p1 }
   0x9   :  { %p330_p4 = pnand %p329_p3, %p323_p0 }
   0xb   :  { %333 = shalt.err (!%p330_p4)
}
   0xc   :  { %s401_s21 = smov 64   ;;  %s402_s22 = smov 4  }
   0xd   :  { %36 = dma.hbm_to_vmem [thread:$0]  %s471_s1, 256, %s31_s19, [#allocation6], %s401_s21, %s401_s21, %s402_s22  }
   0xe   :  { %s403_s25 = smov [#allocation2]  }
   0xf   :  { %s18_s26 = sshll.u32 %s403_s25, 4  ;;  %s19_s26 = int_to_ptr.vmem [resolvable:$true] %s18_s26 }
  0x10   :  { %s342_s27 = scalar_lea.vmem %s19_s26, 256  ;;  %p347_p6 = scmp.lt.s32.totalorder %s19_s26, %s19_s26 }
  0x11   :  { %p343_p5 = scmp.ne.s32.totalorder %s19_s26, %s342_s27  ;;  %p348_p7 = scmp.lt.s32.totalorder %s342_s27, %s342_s27 }
  0x13   :  { %p349_p8 = por %p348_p7, %p347_p6 }
  0x15   :  { %p350_p9 = pnand %p349_p8, %p343_p5 }
  0x17   :  { %353 = shalt.err (!%p350_p9)
}
  0x18   :  { %s404_s28 = smov 128   ;;  %s405_s29 = smov 8  }
  0x19   :  { %24 = dma.hbm_to_vmem [thread:$0]  %s470_s0, 256, %s19_s26, [#allocation3], %s404_s28, %s404_s28, %s405_s29  }
  0x1a   :  { %s406_s1 = smov [#allocation7]  }
  0x1b   :  { %s44_s7 = sshll.u32 %s406_s1, 4  ;;  %s45_s7 = int_to_ptr.vmem [resolvable:$true] %s44_s7 }
  0x1c   :  { %s362_s8 = scalar_lea.vmem %s45_s7, 256  ;;  %p367_p11 = scmp.lt.s32.totalorder %s45_s7, %s45_s7 }
  0x1d   :  { %p363_p10 = scmp.ne.s32.totalorder %s45_s7, %s362_s8  ;;  %p368_p12 = scmp.lt.s32.totalorder %s362_s8, %s362_s8 }
  0x1f   :  { %p369_p13 = por %p368_p12, %p367_p11 }
  0x21   :  { %p370_p0 = pnand %p369_p13, %p363_p10 }
  0x23   :  { %373 = shalt.err (!%p370_p0)
}
  0x24   :  { %50 = dma.hbm_to_vmem [thread:$0]  %s473_s3, 256, %s45_s7, [#allocation6], %s401_s21, %s401_s21, %s402_s22  }
  0x25   :  { %394 = dma.done.wait [#allocation3], 256  }
  0x26   :  { %395 = vsyncadd [#allocation3], 4294967040 }
  0x27   :  { %396 = dma.done.wait [#allocation6], 512  }
  0x28   :  { %397 = vsyncadd [#allocation6], 4294966784  ;;  %v407_v0 = vmov 0.0   ;;  %vm408_vm0 = vmmov 0   ;;  %v302_v1 = vld [vmem:[#allocation5 + $0x8] sm:$0xff]   ;;  %v303_v2 = vld [vmem:[#allocation5] sm:$0xff]  }
  0x29   :  { %276 = vmatprep.subr.bf16.mxu0 %v407_v0  ;;  %280 = vmatprep.mubr.msk.bf16.mxu0 %vm408_vm0, %v407_v0  ;;  %v63_v3 = vld [vmem:[#allocation2] sm:$0xff]  ;;  %v64_v4 = vld [vmem:[#allocation2 + $0x8] sm:$0xff]  ;;  %vm89_vm1 = vcmask 261120   ;;  %s409_s12 = smov [#allocation8]  }
  0x2a   :  { %284 = vmatprep.subr.bf16.mxu1 %v407_v0  ;;  %288 = vmatprep.mubr.msk.bf16.mxu1 %vm408_vm0, %v407_v0  ;;  %v65_v5 = vpack.c.bf16 %v64_v4, %v63_v3  ;;  %v262_v6 = vld [vmem:[%s472_s2] ss:$0 sm:$0xff]  ;;  %v304_v29 = vld [vmem:[#allocation7 + $0x8] sm:$0xff]   ;;  %s249_s13 = sshll.u32 %s409_s12, 4  ;;  %s250_s13 = int_to_ptr.vmem [resolvable:$true] %s249_s13 }
  0x2b   :  { %277 = vmatpush3.bf16.msra.mxu0 %v302_v1  ;;  %285 = vmatpush3.bf16.msra.mxu1 %v304_v29  ;;  %v305_v30 = vld [vmem:[#allocation7] sm:$0xff]   ;;  %s374_s14 = scalar_lea.vmem %s250_s13, 256  ;;  %p379_p2 = scmp.lt.s32.totalorder %s250_s13, %s250_s13 }
  0x2c   :  { %278 = vmatprep.subr.bf16.mxu0 %v407_v0  ;;  %286 = vmatprep.subr.bf16.mxu1 %v407_v0  ;;  %v266_v52 = vld [vmem:[%s474_s4] ss:$0 sm:$0xff]  ;;  %p375_p1 = scmp.ne.s32.totalorder %s250_s13, %s374_s14  ;;  %p380_p3 = scmp.lt.s32.totalorder %s374_s14, %s374_s14 }
  0x2e   :  { %p381_p4 = por %p380_p3, %p379_p2 }
  0x2f   :  { %279 = vmatpush3.bf16.msra.mxu0 %v303_v2  ;;  %287 = vmatpush3.bf16.msra.mxu1 %v305_v30 }
  0x30   :  { %p382_p5 = pnand %p381_p4, %p375_p1 }
  0x32   :  { %281 = vmatmul.mubr.msk.bf16.vlgmr.msra.gmra.mxu0 %vm89_vm1, %v65_v5 }
  0xf2   :  { %v127_v7 = vpop.f32.mrf.mxu0 }
  0xf3   :  { %v128_v8 = vadd.f32 %v262_v6, %v127_v7 }
  0xf4   :  { %v282_v9 = vpop.f32.mrf.mxu0 }
  0xf5   :  { %v136_v10 = vmul.f32 0.70710677, %v128_v8  ;;  %v134_v16 = vmul.f32 0.5, %v128_v8 }
  0xf6   :  { %v130_v11 = vpop.f32.mrf.mxu0 }
  0xf7   :  { %306 = verf.f32 %v136_v10  ;;  %v131_v12 = vadd.f32 %v262_v6, %v130_v11 }
  0xf8   :  { %v283_v13 = vpop.f32.mrf.mxu0 }
  0xf9   :  { %v137_v14 = vmul.f32 0.70710677, %v131_v12  ;;  %v135_v20 = vmul.f32 0.5, %v131_v12 }
  0xfb   :  { %308 = verf.f32 %v137_v14 }
 0x104   :  { %v307_v15 = vpop.eup %306 }
 0x105   :  { %v140_v17 = vadd.f32 1.0, %v307_v15 }
 0x107   :  { %v142_v18 = vmul.f32 %v140_v17, %v134_v16 }
 0x108   :  { %v309_v19 = vpop.eup %308 }
 0x109   :  { %v141_v21 = vadd.f32 1.0, %v309_v19  ;;  %v144_v22 = vsel %vm89_vm1, %v142_v18, 0.0  ;;  %v152_v23 = vmul.f32 %v142_v18, %v142_v18 }
 0x10a   :  { %145 = vadd.xlane.f32.xlu0 %v144_v22 }
 0x10b   :  { %v143_v24 = vmul.f32 %v141_v21, %v135_v20  ;;  %v154_v25 = vsel %vm89_vm1, %v152_v23, 0.0 }
 0x10c   :  { %155 = vadd.xlane.f32.xlu1 %v154_v25 }
 0x10d   :  { %v147_v26 = vsel %vm89_vm1, %v143_v24, 0.0  ;;  %v153_v27 = vmul.f32 %v143_v24, %v143_v24 }
 0x10e   :  { %148 = vadd.xlane.f32.xlu0 %v147_v26 }
 0x10f   :  { %v157_v28 = vsel %vm89_vm1, %v153_v27, 0.0 }
 0x110   :  { %158 = vadd.xlane.f32.xlu1 %v157_v28 }
 0x193   :  { %v146_v31 = vpop.xlane.xlu0 %145 }
 0x194   :  { %v150_v32 = vmul.f32 0.03125, %v146_v31 }
 0x195   :  { %v156_v33 = vpop.xlane.xlu1 %155 }
 0x196   :  { %v162_v34 = vmul.f32 %v150_v32, %v150_v32  ;;  %v160_v35 = vmul.f32 0.03125, %v156_v33  ;;  %v166_v46 = vsub.f32 %v142_v18, %v150_v32 }
 0x197   :  { %v149_v36 = vpop.xlane.xlu0 %148 }
 0x198   :  { %v164_v37 = vsub.f32 %v160_v35, %v162_v34  ;;  %v151_v38 = vmul.f32 0.03125, %v149_v36 }
 0x199   :  { %v159_v39 = vpop.xlane.xlu1 %158 }
 0x19a   :  { %v168_v40 = vadd.f32 1e-05, %v164_v37  ;;  %v163_v41 = vmul.f32 %v151_v38, %v151_v38  ;;  %v161_v42 = vmul.f32 0.03125, %v159_v39  ;;  %v167_v47 = vsub.f32 %v143_v24, %v151_v38 }
 0x19c   :  { %v165_v43 = vsub.f32 %v161_v42, %v163_v41  ;;  %310 = vrsqrt.f32 %v168_v40 }
 0x19e   :  { %v169_v44 = vadd.f32 1e-05, %v165_v43 }
 0x1a0   :  { %312 = vrsqrt.f32 %v169_v44 }
 0x1a9   :  { %v311_v45 = vpop.eup %310 }
 0x1aa   :  { %v172_v49 = vmul.f32 %v311_v45, %v166_v46 }
 0x1ad   :  { %v313_v48 = vpop.eup %312 }
 0x1ae   :  { %v173_v50 = vmul.f32 %v313_v48, %v167_v47 }
 0x1b0   :  { %v174_v51 = vpack.c.bf16 %v173_v50, %v172_v49 }
 0x1b2   :  { %289 = vmatmul.mubr.msk.bf16.vlgmr.msra.gmra.mxu1 %vm89_vm1, %v174_v51 }
 0x272   :  { %v235_v53 = vpop.f32.mrf.mxu1 }
 0x273   :  { %v236_v54 = vadd.f32 %v266_v52, %v235_v53 }
 0x274   :  { %v290_v55 = vpop.f32.mrf.mxu1 }
 0x275   :  { %242 = vst [vmem:[#allocation8] sm:$0xff] %v236_v54 }
 0x276   :  { %v238_v56 = vpop.f32.mrf.mxu1 }
 0x277   :  { %v239_v57 = vadd.f32 %v266_v52, %v238_v56 }
 0x278   :  { %v291_v58 = vpop.f32.mrf.mxu1 }
 0x279   :  { %243 = vst [vmem:[#allocation8 + $0x8] sm:$0xff] %v239_v57 }
 0x27a   :  { %385 = shalt.err (!%p382_p5)
}
 0x27b   :  { %255 = dma.vmem_to_hbm [thread:$0]  %s250_s13, 256, %s475_s5, [#allocation4], %s404_s28, %s404_s28, %s405_s29  }
 0x27c   :  { %398 = dma.done.wait [#allocation4], 256  }
 0x27d   :  { %399 = vsyncadd [#allocation4], 4294967040 }
 0x27e   :  { %259 = vsyncpa [#allocation3], 1 }
 0x27f   :  { %260 = vsyncpa [#allocation6], 1 }
 0x280   :  { %261 = vsyncpa [#allocation4], 1 }

</bundles_post_ra>
